<compile_context>
chip_gen: v7x
topology: tpu7x:2x2x1
jax: 0.10.0
libtpu: 0.0.40
codegen_flags: <defaults>
</compile_context>

<pallas_src>
import jax
import jax.numpy as jnp
from jax.experimental import pallas as pl
from jax.experimental.pallas import tpu as pltpu


def mlp_kernel(x_ref, w1_ref, b1_ref, w2_ref, b2_ref, w3_ref, b3_ref, o_ref):
    x = x_ref[...]                                              # (tm, 17)

    # Layer 1: Linear(17 -> 64) + ReLU   (MXU)
    h1 = jnp.dot(x, w1_ref[...], preferred_element_type=jnp.float32) + b1_ref[...]
    h1 = jnp.maximum(h1, 0.0)

    # Layer 2: Linear(64 -> 32) + ReLU   (MXU)
    h2 = jnp.dot(h1, w2_ref[...], preferred_element_type=jnp.float32) + b2_ref[...]
    h2 = jnp.maximum(h2, 0.0)

    # Layer 3: Linear(32 -> 1) on the VPU/XLU: broadcast-multiply by the w3
    # row and reduce over the 32 features, producing a lane-dense
    # (tm//128, 128) slab directly (tile row r lands at out[r//128, r%128]).
    # This avoids both a <1%-utilized MXU pass and masked 1-lane stores.
    g = o_ref.shape[0]                                          # tm // 128
    h3 = h2 * w3_ref[...]                                       # (tm, 32)
    out = jnp.sum(h3.reshape(g, 128, h3.shape[-1]), axis=-1)    # (g, 128)
    o_ref[...] = (out + b3_ref[...]).astype(o_ref.dtype)


def mlp_forward(x, params, *, block_rows=4096):
    """x: [N, 17] float32. Returns [N, 1] float32."""
    w1, b1, w2, b2, w3, b3 = params
    N, d_in = x.shape
    assert d_in == 17

    # Row-tile selection:
    #  * The output block is (tm//128, 128); unless it covers the whole output
    #    slab, its second-to-last dim must be a multiple of 8, so multi-step
    #    tiles must be multiples of 1024 rows.
    #  * block_rows=4096 keeps VMEM tiny on all generations (incl. v7x's
    #    smaller VMEM); raise to 8192 for very large N if desired.  N >
    #    block_rows gives >=2 grid steps so both v7x TensorCores get work via
    #    the "parallel" grid axis.
    assert block_rows % 1024 == 0
    n_pad128 = ((N + 127) // 128) * 128
    tm = n_pad128 if n_pad128 <= block_rows else block_rows
    n_pad = ((N + tm - 1) // tm) * tm
    if n_pad != N:
        x = jnp.pad(x, ((0, n_pad - N), (0, 0)))

    grid = (n_pad // tm,)

    # Weights/biases are tiny -> replicate the full arrays to every grid step.
    def rep(shape):
        return pl.BlockSpec(shape, lambda i: (0,) * len(shape))

    flops = 2 * n_pad * (17 * 64 + 64 * 32 + 32)
    weight_bytes = 4 * (17 * 64 + 64 + 64 * 32 + 32 + 32 + 1)
    bytes_accessed = n_pad * 17 * 4 + n_pad * 4 + weight_bytes

    out_slab = pl.pallas_call(
        mlp_kernel,
        out_shape=jax.ShapeDtypeStruct((n_pad // 128, 128), jnp.float32),
        grid_spec=pltpu.PrefetchScalarGridSpec(
            num_scalar_prefetch=0,
            grid=grid,
            in_specs=[
                pl.BlockSpec((tm, 17), lambda i: (i, 0)),   # x tile
                rep((17, 64)),                              # W1  [in, out]
                rep((1, 64)),                               # b1
                rep((64, 32)),                              # W2  [in, out]
                rep((1, 32)),                               # b2
                rep((1, 32)),                               # w3  (PyTorch layout [1, 32])
                rep((1, 1)),                                # b3
            ],
            out_specs=pl.BlockSpec((tm // 128, 128), lambda i: (i, 0)),
        ),
        compiler_params=pltpu.CompilerParams(
            dimension_semantics=("parallel",),
        ),
        cost_estimate=pl.CostEstimate(
            flops=flops, transcendentals=0, bytes_accessed=bytes_accessed),
    )(x, w1, b1, w2, b2, w3, b3)

    # Lane-dense slab -> [N, 1] column (pure layout plumbing in the wrapper).
    return out_slab.reshape(n_pad, 1)[:N]


def init_params(key):
    """Deterministic init; shapes follow nn.Linear(17,64), (64,32), (32,1).
    w1/w2 are stored as [in, out]; w3 keeps PyTorch's (1, 32) layout."""
    k1, k2, k3, k4, k5, k6 = jax.random.split(key, 6)
    w1 = jax.random.normal(k1, (17, 64), jnp.float32) * 0.1
    b1 = jax.random.normal(k2, (1, 64), jnp.float32) * 0.1
    w2 = jax.random.normal(k3, (64, 32), jnp.float32) * 0.1
    b2 = jax.random.normal(k4, (1, 32), jnp.float32) * 0.1
    w3 = jax.random.normal(k5, (1, 32), jnp.float32) * 0.1
    b3 = jax.random.normal(k6, (1, 1), jnp.float32) * 0.1
    return (w1, b1, w2, b2, w3, b3)


def mlp_reference(x, params):
    w1, b1, w2, b2, w3, b3 = params
    h1 = jnp.maximum(x @ w1 + b1, 0.0)
    h2 = jnp.maximum(h1 @ w2 + b2, 0.0)
    return h2 @ w3.T + b3


if __name__ == "__main__":
    key = jax.random.PRNGKey(0)
    kx, kx2, kp = jax.random.split(key, 3)
    params = init_params(kp)

    # Small ragged batch: exercises zero-padding and the single-tile path.
    N = 300
    x = jax.random.normal(kx, (N, 17), jnp.float32)
    out = jax.block_until_ready(mlp_forward(x, params))
    ref = mlp_reference(x, params)
    assert out.shape == (N, 1)
    assert jnp.allclose(out, ref, atol=1e-4, rtol=1e-4), "mismatch vs. reference (small)"

    # Multi-tile path: >=2 grid steps (megacore) + ragged tail with a 1024-row tile.
    N2 = 2500
    x2 = jax.random.normal(kx2, (N2, 17), jnp.float32)
    out2 = jax.block_until_ready(mlp_forward(x2, params, block_rows=1024))
    ref2 = mlp_reference(x2, params)
    assert out2.shape == (N2, 1)
    assert jnp.allclose(out2, ref2, atol=1e-4, rtol=1e-4), "mismatch vs. reference (tiled)"

    print("KERNEL_OK")
</pallas_src>

<mosaic_0001>
module attributes {stable_mosaic.version = 11 : i64} {
  func.func @mlp_kernel(%arg0: i32, %arg1: memref<384x17xf32, #tpu.memory_space<vmem>>, %arg2: memref<17x64xf32, #tpu.memory_space<vmem>>, %arg3: memref<1x64xf32, #tpu.memory_space<vmem>>, %arg4: memref<64x32xf32, #tpu.memory_space<vmem>>, %arg5: memref<1x32xf32, #tpu.memory_space<vmem>>, %arg6: memref<1x32xf32, #tpu.memory_space<vmem>>, %arg7: memref<1x1xf32, #tpu.memory_space<vmem>>, %arg8: memref<3x128xf32, #tpu.memory_space<vmem>>) attributes {dimension_semantics = [#tpu.dimension_semantics<parallel>], iteration_bounds = array<i64: 1>, scalar_prefetch = 0 : i64, scratch_operands = 0 : i64, tpu.core_type = #tpu.core_type<tc>, window_params = [{transform_indices = @transform_0, window_bounds = array<i64: 384, 17>}, {pipeline_mode = #tpu.pipeline_mode<synchronous>, transform_indices = @transform_1, window_bounds = array<i64: 17, 64>}, {pipeline_mode = #tpu.pipeline_mode<synchronous>, transform_indices = @transform_2, window_bounds = array<i64: 1, 64>}, {pipeline_mode = #tpu.pipeline_mode<synchronous>, transform_indices = @transform_3, window_bounds = array<i64: 64, 32>}, {pipeline_mode = #tpu.pipeline_mode<synchronous>, transform_indices = @transform_4, window_bounds = array<i64: 1, 32>}, {pipeline_mode = #tpu.pipeline_mode<synchronous>, transform_indices = @transform_5, window_bounds = array<i64: 1, 32>}, {pipeline_mode = #tpu.pipeline_mode<synchronous>, transform_indices = @transform_6, window_bounds = array<i64: 1, 1>}, {transform_indices = @transform_7, window_bounds = array<i64: 3, 128>}]} {
    %c0 = arith.constant 0 : index
    %c0_0 = arith.constant 0 : index
    %0 = vector.load %arg1[%c0, %c0_0] : memref<384x17xf32, #tpu.memory_space<vmem>>, vector<384x17xf32>
    %c0_1 = arith.constant 0 : index
    %c0_2 = arith.constant 0 : index
    %1 = vector.load %arg2[%c0_1, %c0_2] : memref<17x64xf32, #tpu.memory_space<vmem>>, vector<17x64xf32>
    %cst = arith.constant dense<0.000000e+00> : vector<384x64xf32>
    %2 = tpu.matmul %0, %1, %cst {dimension_numbers = #tpu.dot_dimension_numbers<[1], [0], [0], [1], [0, 0, 1, 1], [], []>} : vector<384x17xf32>, vector<17x64xf32>, vector<384x64xf32> -> vector<384x64xf32>
    %c0_3 = arith.constant 0 : index
    %c0_4 = arith.constant 0 : index
    %3 = vector.load %arg3[%c0_3, %c0_4] : memref<1x64xf32, #tpu.memory_space<vmem>>, vector<1x64xf32>
    %4 = vector.broadcast %3 : vector<1x64xf32> to vector<384x64xf32>
    %5 = arith.addf %2, %4 : vector<384x64xf32>
    %cst_5 = arith.constant 0.000000e+00 : f32
    %6 = vector.broadcast %cst_5 : f32 to vector<384x64xf32>
    %7 = arith.maximumf %5, %6 : vector<384x64xf32>
    %c0_6 = arith.constant 0 : index
    %c0_7 = arith.constant 0 : index
    %8 = vector.load %arg4[%c0_6, %c0_7] : memref<64x32xf32, #tpu.memory_space<vmem>>, vector<64x32xf32>
    %cst_8 = arith.constant dense<0.000000e+00> : vector<384x32xf32>
    %9 = tpu.matmul %7, %8, %cst_8 {dimension_numbers = #tpu.dot_dimension_numbers<[1], [0], [0], [1], [0, 0, 1, 1], [], []>} : vector<384x64xf32>, vector<64x32xf32>, vector<384x32xf32> -> vector<384x32xf32>
    %c0_9 = arith.constant 0 : index
    %c0_10 = arith.constant 0 : index
    %10 = vector.load %arg5[%c0_9, %c0_10] : memref<1x32xf32, #tpu.memory_space<vmem>>, vector<1x32xf32>
    %11 = vector.broadcast %10 : vector<1x32xf32> to vector<384x32xf32>
    %12 = arith.addf %9, %11 : vector<384x32xf32>
    %cst_11 = arith.constant 0.000000e+00 : f32
    %13 = vector.broadcast %cst_11 : f32 to vector<384x32xf32>
    %14 = arith.maximumf %12, %13 : vector<384x32xf32>
    %c0_12 = arith.constant 0 : index
    %c0_13 = arith.constant 0 : index
    %15 = vector.load %arg6[%c0_12, %c0_13] : memref<1x32xf32, #tpu.memory_space<vmem>>, vector<1x32xf32>
    %16 = vector.broadcast %15 : vector<1x32xf32> to vector<384x32xf32>
    %17 = arith.mulf %14, %16 : vector<384x32xf32>
    %18 = vector.shape_cast %17 : vector<384x32xf32> to vector<3x128x32xf32>
    %cst_14 = arith.constant dense<0.000000e+00> : vector<3x128xf32>
    %19 = vector.multi_reduction <add>, %18, %cst_14 [2] : vector<3x128x32xf32> to vector<3x128xf32>
    %c0_15 = arith.constant 0 : index
    %c0_16 = arith.constant 0 : index
    %20 = vector.load %arg7[%c0_15, %c0_16] : memref<1x1xf32, #tpu.memory_space<vmem>>, vector<1x1xf32>
    %21 = vector.broadcast %20 : vector<1x1xf32> to vector<3x128xf32>
    %22 = arith.addf %19, %21 : vector<3x128xf32>
    %c0_17 = arith.constant 0 : index
    %c0_18 = arith.constant 0 : index
    %23 = vector.load %arg8[%c0_17, %c0_18] : memref<3x128xf32, #tpu.memory_space<vmem>>, vector<3x128xf32>
    tpu.vector_store %arg8[%c0_17, %c0_18], %22 {strides = array<i32>} : memref<3x128xf32, #tpu.memory_space<vmem>>, vector<3x128xf32>,
    return
  }
  func.func @transform_0(%arg0: i32) -> (i32, i32) {
    %c0_i32 = arith.constant 0 : i32
    %c0_i32_0 = arith.constant 0 : i32
    return %arg0, %c0_i32 : i32, i32
  }
  func.func @transform_1(%arg0: i32) -> (i32, i32) {
    %c0_i32 = arith.constant 0 : i32
    %c0_i32_0 = arith.constant 0 : i32
    %c0_i32_1 = arith.constant 0 : i32
    return %c0_i32, %c0_i32_0 : i32, i32
  }
  func.func @transform_2(%arg0: i32) -> (i32, i32) {
    %c0_i32 = arith.constant 0 : i32
    %c0_i32_0 = arith.constant 0 : i32
    %c0_i32_1 = arith.constant 0 : i32
    return %c0_i32, %c0_i32_0 : i32, i32
  }
  func.func @transform_3(%arg0: i32) -> (i32, i32) {
    %c0_i32 = arith.constant 0 : i32
    %c0_i32_0 = arith.constant 0 : i32
    %c0_i32_1 = arith.constant 0 : i32
    return %c0_i32, %c0_i32_0 : i32, i32
  }
  func.func @transform_4(%arg0: i32) -> (i32, i32) {
    %c0_i32 = arith.constant 0 : i32
    %c0_i32_0 = arith.constant 0 : i32
    %c0_i32_1 = arith.constant 0 : i32
    return %c0_i32, %c0_i32_0 : i32, i32
  }
  func.func @transform_5(%arg0: i32) -> (i32, i32) {
    %c0_i32 = arith.constant 0 : i32
    %c0_i32_0 = arith.constant 0 : i32
    %c0_i32_1 = arith.constant 0 : i32
    return %c0_i32, %c0_i32_0 : i32, i32
  }
  func.func @transform_6(%arg0: i32) -> (i32, i32) {
    %c0_i32 = arith.constant 0 : i32
    %c0_i32_0 = arith.constant 0 : i32
    %c0_i32_1 = arith.constant 0 : i32
    return %c0_i32, %c0_i32_0 : i32, i32
  }
  func.func @transform_7(%arg0: i32) -> (i32, i32) {
    %c0_i32 = arith.constant 0 : i32
    %c0_i32_0 = arith.constant 0 : i32
    return %arg0, %c0_i32 : i32, i32
  }
}

</mosaic_0001>

<bundles_post_ra>
// kernel: tpu_custom_call.1
= control target key start
LH: loop header
LB: loop body
LE: loop exit
PB: predicated region body
PF: predicated region fallthrough
CT: control target
= control target key end

     0   :  { %s2899_s0 = inlined_call_operand.vmem [shape: f32[384,17], index: 0, kind: input, shape index: {}]   ;;  %s2900_s1 = inlined_call_operand.vmem [shape: f32[17,64], index: 1, kind: input, shape index: {}]   ;;  %s2901_s2 = inlined_call_operand.vmem [shape: f32[1,64], index: 2, kind: input, shape index: {}]   ;;  %s2902_s3 = inlined_call_operand.vmem [shape: f32[64,32], index: 3, kind: input, shape index: {}]   ;;  %s2903_s4 = inlined_call_operand.vmem [shape: f32[1,32], index: 4, kind: input, shape index: {}]   ;;  %s2904_s5 = inlined_call_operand.vmem [shape: f32[1,32], index: 5, kind: input, shape index: {}]   ;;  %s2905_s6 = inlined_call_operand.<no memory space> [shape: f32[1,1], index: 6, kind: input, shape index: {}]   ;;  %s2906_s7 = inlined_call_operand.hbm [shape: f32[3,128], index: 7, kind: output, shape index: {}]  }
   0x1   :  { %v12_v0 = vstv %s2905_s6 }
   0x2   :  { %13 = vst [vmem:[#allocation2] sm:$0x1] %v12_v0 }
   0x3   :  { %v77_v1 = vld [vmem:[%s2900_s1] sm:$0xff]  ;;  %v78_v2 = vld [vmem:[%s2900_s1 + $0x8] sm:$0xff]  ;;  %vm87_vm0 = vcmask 138240   ;;  %v79_v5 = vld [vmem:[%s2900_s1 + $0x10] sm:$0x1]  ;;  %vm232_vm1 = vcmask 1040384  }
   0x4   :  { %v2071_v3 = vpack.c.bf16 %v78_v2, %v77_v1  ;;  %v29_v4 = vld [vmem:[%s2899_s0] sm:$0xff]  ;;  %v30_v6 = vld [vmem:[%s2899_s0 + $0x8] sm:$0xff]  ;;  %v31_v7 = vld [vmem:[%s2899_s0 + $0x10] sm:$0xff] }
   0x5   :  { %1911 = vmatprep.mubr.msk.f32.mxu0 %vm87_vm0, %v29_v4  ;;  %v32_v8 = vld [vmem:[%s2899_s0 + $0x18] sm:$0xff]  ;;  %v33_v9 = vld [vmem:[%s2899_s0 + $0x20] sm:$0xff]  ;;  %v34_v10 = vld [vmem:[%s2899_s0 + $0x28] sm:$0xff] }
   0x6   :  { %2072 = vmatprep.subr.bf16.mxu0 %v2071_v3  ;;  %v35_v11 = vld [vmem:[%s2899_s0 + $0x30] sm:$0xff]  ;;  %v589_v12 = vld [vmem:[%s2902_s3] sm:$0xff]  ;;  %v590_v13 = vld [vmem:[%s2902_s3 + $0x8] sm:$0xff] }
   0x7   :  { %2074 = vmatpush3.bf16.msra.mxu0 %v2071_v3  ;;  %v591_v14 = vld [vmem:[%s2902_s3 + $0x10] sm:$0xff]  ;;  %v36_v15 = vld [vmem:[%s2899_s0 + $0x38] sm:$0xff]  ;;  %v2075_v16 = vpack.c.bf16 %v590_v13, %v589_v12  ;;  %v37_v18 = vld [vmem:[%s2899_s0 + $0x40] sm:$0xff] }
   0x8   :  { %1909 = vmatprep.subr.msk.mxu0 %vm232_vm1, %v79_v5  ;;  %v592_v17 = vld [vmem:[%s2902_s3 + $0x18] sm:$0xff] }
   0x9   :  { %v2079_v19 = vpack.c.bf16 %v592_v17, %v591_v14 }
   0xb   :  { %1910 = vmatpush3.msk.msra.mxu0 %vm232_vm1, %v79_v5 }
   0xc   :  { %1912 = vmatmul.mubr.msk.f32.vlgmr.msra.gmra.mrb[0].mxu0 %vm87_vm0, %v30_v6 }
   0xd   :  { %1914 = vmatprep.mubr.msk.f32.mxu0 %vm87_vm0, %v31_v7 }
  0x10   :  { %1915 = vmatmul.mubr.msk.f32.gmra.mrb[2].mxu0 %vm87_vm0, %v32_v8 }
  0x11   :  { %1917 = vmatprep.mubr.msk.f32.mxu0 %vm87_vm0, %v33_v9 }
  0x14   :  { %1918 = vmatmul.mubr.msk.f32.gmra.mrb[4].mxu0 %vm87_vm0, %v34_v10 }
  0x15   :  { %1920 = vmatprep.mubr.msk.f32.mxu0 %vm87_vm0, %v35_v11 }
  0x16   :  { %14 = vsyncpa [#allocation4], 0  ;;  %2076 = vmatprep.subr.bf16.mxu0 %v2075_v16  ;;  %v593_v20 = vld [vmem:[%s2902_s3 + $0x20] sm:$0xff]  ;;  %v594_v21 = vld [vmem:[%s2902_s3 + $0x28] sm:$0xff]  ;;  %2091 = vmatprep.subr.bf16.mxu1 %v2075_v16  ;;  %v2127_v2 = vmov 0   ;;  %vm604_vm2 = vcmask 523264  }
  0x17   :  { %2095 = vmatpush3.bf16.msra.mxu1 %v2075_v16  ;;  %v38_v22 = vld [vmem:[%s2899_s0 + $0x48] sm:$0xff]  ;;  %2078 = vmatpush3.bf16.msra.mxu0 %v2075_v16  ;;  %v39_v23 = vld [vmem:[%s2899_s0 + $0x50] sm:$0xff]  ;;  %v2083_v24 = vpack.c.bf16 %v594_v21, %v593_v20  ;;  %v40_v25 = vld [vmem:[%s2899_s0 + $0x58] sm:$0xff]  ;;  %vm1157_vm3 = vcmask 261120   ;;  %vm1419_vm4 = vcmask 130112   ;;  %vm1426_vm5 = vcmask 195712  }
  0x18   :  { %1921 = vmatmul.mubr.msk.f32.gmra.mrb[6].mxu0 %vm87_vm0, %v36_v15  ;;  %2080 = vmatprep.subr.bf16.mxu0 %v2079_v19  ;;  %v41_v26 = vld [vmem:[%s2899_s0 + $0x60] sm:$0xff]  ;;  %v42_v27 = vld [vmem:[%s2899_s0 + $0x68] sm:$0xff]  ;;  %v43_v28 = vld [vmem:[%s2899_s0 + $0x70] sm:$0xff]  ;;  %vm1433_vm6 = vcmask 261312   ;;  %vm1440_vm7 = vcmask 326912   ;;  %vm1447_vm8 = vcmask 392512  }
  0x19   :  { %1923 = vmatprep.mubr.msk.f32.mxu0 %vm87_vm0, %v37_v18  ;;  %2092 = vmatprep.subr.bf16.mxu1 %v2079_v19  ;;  %v44_v29 = vld [vmem:[%s2899_s0 + $0x78] sm:$0xff]  ;;  %v45_v30 = vld [vmem:[%s2899_s0 + $0x80] sm:$0xff]  ;;  %v46_v31 = vld [vmem:[%s2899_s0 + $0x88] sm:$0xff]  ;;  %vm1454_vm9 = vcmask 458112   ;;  %vm1461_vm10 = vcmask 523712   ;;  %vm1468_vm11 = vcmask 589312  }
  0x1a   :  { %v47_v32 = vld [vmem:[%s2899_s0 + $0x90] sm:$0xff]  ;;  %v48_v33 = vld [vmem:[%s2899_s0 + $0x98] sm:$0xff]  ;;  %v49_v34 = vld [vmem:[%s2899_s0 + $0xa0] sm:$0xff]  ;;  %2101 = vset.pattern.permute.xlu1 %v2127_v2  ;;  %2102 = vset.pattern.permute.xlu0 %v2127_v2  ;;  %vm1475_vm12 = vcmask 654912   ;;  %vm1482_vm13 = vcmask 720512   ;;  %vm1489_vm14 = vcmask 786112  }
  0x1b   :  { %2096 = vmatpush3.bf16.msra.mxu1 %v2079_v19  ;;  %2082 = vmatpush3.bf16.msra.mxu0 %v2079_v19  ;;  %v50_v35 = vld [vmem:[%s2899_s0 + $0xa8] sm:$0xff]  ;;  %v51_v36 = vld [vmem:[%s2899_s0 + $0xb0] sm:$0xff]  ;;  %v52_v37 = vld [vmem:[%s2899_s0 + $0xb8] sm:$0xff]  ;;  %vm1496_vm15 = vcmask 851712   ;;  %vm1510_vm1 = vcmask 982912  }
  0x1c   :  { %1924 = vmatmul.mubr.msk.f32.gmra.mrb[8].mxu0 %vm87_vm0, %v38_v22  ;;  %2084 = vmatprep.subr.bf16.mxu0 %v2083_v24  ;;  %v53_v38 = vld [vmem:[%s2899_s0 + $0xc0] sm:$0xff]  ;;  %v54_v39 = vld [vmem:[%s2899_s0 + $0xc8] sm:$0xff]  ;;  %v55_v40 = vld [vmem:[%s2899_s0 + $0xd0] sm:$0xff] }
  0x1d   :  { %1926 = vmatprep.mubr.msk.f32.mxu0 %vm87_vm0, %v39_v23  ;;  %2093 = vmatprep.subr.bf16.mxu1 %v2083_v24  ;;  %v56_v41 = vld [vmem:[%s2899_s0 + $0xd8] sm:$0xff]  ;;  %v57_v42 = vld [vmem:[%s2899_s0 + $0xe0] sm:$0xff]  ;;  %v58_v43 = vld [vmem:[%s2899_s0 + $0xe8] sm:$0xff] }
  0x1e   :  { %v59_v44 = vld [vmem:[%s2899_s0 + $0xf0] sm:$0xff]  ;;  %v60_v45 = vld [vmem:[%s2899_s0 + $0xf8] sm:$0xff]  ;;  %v61_v46 = vld [vmem:[%s2899_s0 + $0x100] sm:$0xff] }
  0x1f   :  { %2097 = vmatpush3.bf16.msra.mxu1 %v2083_v24  ;;  %2086 = vmatpush3.bf16.msra.mxu0 %v2083_v24  ;;  %v62_v47 = vld [vmem:[%s2899_s0 + $0x108] sm:$0xff]  ;;  %v63_v48 = vld [vmem:[%s2899_s0 + $0x110] sm:$0xff]  ;;  %v64_v49 = vld [vmem:[%s2899_s0 + $0x118] sm:$0xff] }
  0x20   :  { %1927 = vmatmul.mubr.msk.f32.gmra.mrb[10].mxu0 %vm87_vm0, %v40_v25  ;;  %v65_v50 = vld [vmem:[%s2899_s0 + $0x120] sm:$0xff]  ;;  %v66_v51 = vld [vmem:[%s2899_s0 + $0x128] sm:$0xff]  ;;  %v67_v52 = vld [vmem:[%s2899_s0 + $0x130] sm:$0xff] }
  0x21   :  { %1929 = vmatprep.mubr.msk.f32.mxu0 %vm87_vm0, %v41_v26  ;;  %v68_v53 = vld [vmem:[%s2899_s0 + $0x138] sm:$0xff]  ;;  %v69_v54 = vld [vmem:[%s2899_s0 + $0x140] sm:$0xff]  ;;  %v70_v55 = vld [vmem:[%s2899_s0 + $0x148] sm:$0xff] }
  0x22   :  { %v71_v56 = vld [vmem:[%s2899_s0 + $0x150] sm:$0xff]  ;;  %v72_v57 = vld [vmem:[%s2899_s0 + $0x158] sm:$0xff]  ;;  %v73_v58 = vld [vmem:[%s2899_s0 + $0x160] sm:$0xff] }
  0x23   :  { %v595_v59 = vld [vmem:[%s2902_s3 + $0x30] sm:$0xff]  ;;  %v596_v60 = vld [vmem:[%s2902_s3 + $0x38] sm:$0xff]  ;;  %v74_v62 = vld [vmem:[%s2899_s0 + $0x168] sm:$0xff] }
  0x24   :  { %1930 = vmatmul.mubr.msk.f32.gmra.mrb[12].mxu0 %vm87_vm0, %v42_v27  ;;  %v2087_v61 = vpack.c.bf16 %v596_v60, %v595_v59  ;;  %v75_v63 = vld [vmem:[%s2899_s0 + $0x170] sm:$0xff]  ;;  %v76_v0 = vld [vmem:[%s2899_s0 + $0x178] sm:$0xff]  ;;  %v1797_v1 = vld [vmem:[#allocation2] ss:$0 sm:$0xff] }
  0x25   :  { %1932 = vmatprep.mubr.msk.f32.mxu0 %vm87_vm0, %v43_v28  ;;  %1309 = vperm.xlu1 %2101, %v1797_v1   ;;  %v2400_v3 = vld [vmem:[%s2901_s2] ss:$0 sm:$0xff] }
  0x26   :  { %2088 = vmatprep.subr.bf16.mxu0 %v2087_v61  ;;  %2094 = vmatprep.subr.bf16.mxu1 %v2087_v61 }
  0x27   :  { %2090 = vmatpush3.bf16.msra.mxu0 %v2087_v61  ;;  %2098 = vmatpush3.bf16.msra.mxu1 %v2087_v61 }
  0x28   :  { %1933 = vmatmul.mubr.msk.f32.gmra.mrb[14].mxu0 %vm87_vm0, %v44_v29 }
  0x29   :  { %1935 = vmatprep.mubr.msk.f32.mxu0 %vm87_vm0, %v45_v30 }
  0x2c   :  { %1936 = vmatmul.mubr.msk.f32.gmra.mrb[16].mxu0 %vm87_vm0, %v46_v31 }
  0x2d   :  { %1938 = vmatprep.mubr.msk.f32.mxu0 %vm87_vm0, %v47_v32 }
  0x30   :  { %1939 = vmatmul.mubr.msk.f32.gmra.mrb[18].mxu0 %vm87_vm0, %v48_v33 }
  0x31   :  { %1941 = vmatprep.mubr.msk.f32.mxu0 %vm87_vm0, %v49_v34 }
  0x34   :  { %1942 = vmatmul.mubr.msk.f32.gmra.mrb[20].mxu0 %vm87_vm0, %v50_v35 }
  0x35   :  { %1944 = vmatprep.mubr.msk.f32.mxu0 %vm87_vm0, %v51_v36 }
  0x38   :  { %1945 = vmatmul.mubr.msk.f32.gmra.mrb[22].mxu0 %vm87_vm0, %v52_v37 }
  0x39   :  { %1947 = vmatprep.mubr.msk.f32.mxu0 %vm87_vm0, %v53_v38 }
  0x3c   :  { %1948 = vmatmul.mubr.msk.f32.gmra.mrb[24].mxu0 %vm87_vm0, %v54_v39 }
  0x3d   :  { %1950 = vmatprep.mubr.msk.f32.mxu0 %vm87_vm0, %v55_v40 }
  0x40   :  { %1951 = vmatmul.mubr.msk.f32.gmra.mrb[26].mxu0 %vm87_vm0, %v56_v41 }
  0x41   :  { %1953 = vmatprep.mubr.msk.f32.mxu0 %vm87_vm0, %v57_v42 }
  0x44   :  { %1954 = vmatmul.mubr.msk.f32.gmra.mrb[28].mxu0 %vm87_vm0, %v58_v43 }
  0x45   :  { %1956 = vmatprep.mubr.msk.f32.mxu0 %vm87_vm0, %v59_v44 }
  0x48   :  { %1957 = vmatmul.mubr.msk.f32.gmra.mrb[30].mxu0 %vm87_vm0, %v60_v45 }
  0x49   :  { %1959 = vmatprep.mubr.msk.f32.mxu0 %vm87_vm0, %v61_v46 }
  0x4c   :  { %1960 = vmatmul.mubr.msk.f32.gmra.mrb[32].mxu0 %vm87_vm0, %v62_v47 }
  0x4d   :  { %1962 = vmatprep.mubr.msk.f32.mxu0 %vm87_vm0, %v63_v48 }
  0x50   :  { %1963 = vmatmul.mubr.msk.f32.gmra.mrb[34].mxu0 %vm87_vm0, %v64_v49 }
  0x51   :  { %1965 = vmatprep.mubr.msk.f32.mxu0 %vm87_vm0, %v65_v50 }
  0x54   :  { %1966 = vmatmul.mubr.msk.f32.gmra.mrb[36].mxu0 %vm87_vm0, %v66_v51 }
  0x55   :  { %1968 = vmatprep.mubr.msk.f32.mxu0 %vm87_vm0, %v67_v52 }
  0x58   :  { %1969 = vmatmul.mubr.msk.f32.gmra.mrb[38].mxu0 %vm87_vm0, %v68_v53 }
  0x59   :  { %1971 = vmatprep.mubr.msk.f32.mxu0 %vm87_vm0, %v69_v54 }
  0x5c   :  { %1972 = vmatmul.mubr.msk.f32.gmra.mrb[40].mxu0 %vm87_vm0, %v70_v55 }
  0x5d   :  { %1974 = vmatprep.mubr.msk.f32.mxu0 %vm87_vm0, %v71_v56 }
  0x60   :  { %1975 = vmatmul.mubr.msk.f32.gmra.mrb[42].mxu0 %vm87_vm0, %v72_v57 }
  0x61   :  { %1977 = vmatprep.mubr.msk.f32.mxu0 %vm87_vm0, %v73_v58 }
  0x64   :  { %1978 = vmatmul.mubr.msk.f32.gmra.mrb[44].mxu0 %vm87_vm0, %v74_v62 }
  0x65   :  { %1980 = vmatprep.mubr.msk.f32.mxu0 %vm87_vm0, %v75_v63 }
  0x68   :  { %1981 = vmatmul.mubr.msk.f32.gmra.mrb[46].mxu0 %vm87_vm0, %v76_v0  ;;  %vm1503_vm0 = vcmask 917312  }
  0xdf   :  { %v1913_v4 = vpop.f32.mrb[0].mxu0 }
  0xe0   :  { %v308_v5 = vadd.f32 %v1913_v4, %v2400_v3  ;;  %v302_v6 = vpop.f32.mrb[1].mxu0 }
  0xe1   :  { %v303_v7 = vadd.f32 %v2400_v3, %v302_v6 }
  0xe2   :  { %v542_v10 = vmax.f32 %v308_v5, 0.0 }
  0xe3   :  { %v541_v8 = vmax.f32 %v303_v7, 0.0  ;;  %v1916_v9 = vpop.f32.mrb[2].mxu0 }
  0xe4   :  { %v318_v11 = vadd.f32 %v1916_v9, %v2400_v3  ;;  %v312_v12 = vpop.f32.mrb[3].mxu0 }
  0xe5   :  { %v313_v13 = vadd.f32 %v2400_v3, %v312_v12  ;;  %1999 = vmatprep.mubr.msk.f32.mxu0 %vm604_vm2, %v541_v8 }
  0xe6   :  { %2000 = vmatmul.mubr.msk.f32.vlgmr.msra.gmra.mrb[48].mxu0 %vm604_vm2, %v542_v10  ;;  %v544_v16 = vmax.f32 %v318_v11, 0.0 }
  0xe7   :  { %v543_v14 = vmax.f32 %v313_v13, 0.0  ;;  %v1919_v15 = vpop.f32.mrb[4].mxu0 }
  0xe8   :  { %v328_v17 = vadd.f32 %v1919_v15, %v2400_v3  ;;  %v322_v18 = vpop.f32.mrb[5].mxu0 }
  0xe9   :  { %v323_v19 = vadd.f32 %v2400_v3, %v322_v18  ;;  %2002 = vmatprep.mubr.msk.f32.mxu1 %vm604_vm2, %v543_v14 }
  0xea   :  { %2003 = vmatmul.mubr.msk.f32.vlgmr.msra.gmra.mrb[0].mxu1 %vm604_vm2, %v544_v16  ;;  %v546_v22 = vmax.f32 %v328_v17, 0.0 }
  0xeb   :  { %v545_v20 = vmax.f32 %v323_v19, 0.0  ;;  %v1922_v21 = vpop.f32.mrb[6].mxu0 }
  0xec   :  { %v338_v23 = vadd.f32 %v1922_v21, %v2400_v3  ;;  %v332_v24 = vpop.f32.mrb[7].mxu0 }
  0xed   :  { %v333_v25 = vadd.f32 %v2400_v3, %v332_v24  ;;  %2005 = vmatprep.mubr.msk.f32.mxu1 %vm604_vm2, %v545_v20 }
  0xee   :  { %2006 = vmatmul.mubr.msk.f32.gmra.mrb[2].mxu1 %vm604_vm2, %v546_v22  ;;  %v548_v28 = vmax.f32 %v338_v23, 0.0 }
  0xef   :  { %v547_v26 = vmax.f32 %v333_v25, 0.0  ;;  %v1925_v27 = vpop.f32.mrb[8].mxu0 }
  0xf0   :  { %v348_v29 = vadd.f32 %v1925_v27, %v2400_v3  ;;  %v342_v30 = vpop.f32.mrb[9].mxu0 }
  0xf1   :  { %v343_v31 = vadd.f32 %v2400_v3, %v342_v30  ;;  %2008 = vmatprep.mubr.msk.f32.mxu1 %vm604_vm2, %v547_v26 }
  0xf2   :  { %2009 = vmatmul.mubr.msk.f32.gmra.mrb[4].mxu1 %vm604_vm2, %v548_v28  ;;  %v550_v34 = vmax.f32 %v348_v29, 0.0 }
  0xf3   :  { %v549_v32 = vmax.f32 %v343_v31, 0.0  ;;  %v1928_v33 = vpop.f32.mrb[10].mxu0 }
  0xf4   :  { %v358_v35 = vadd.f32 %v1928_v33, %v2400_v3  ;;  %v352_v36 = vpop.f32.mrb[11].mxu0 }
  0xf5   :  { %v353_v37 = vadd.f32 %v2400_v3, %v352_v36  ;;  %2011 = vmatprep.mubr.msk.f32.mxu1 %vm604_vm2, %v549_v32 }
  0xf6   :  { %2012 = vmatmul.mubr.msk.f32.gmra.mrb[6].mxu1 %vm604_vm2, %v550_v34  ;;  %v552_v40 = vmax.f32 %v358_v35, 0.0 }
  0xf7   :  { %v551_v38 = vmax.f32 %v353_v37, 0.0  ;;  %v1931_v39 = vpop.f32.mrb[12].mxu0 }
  0xf8   :  { %v368_v41 = vadd.f32 %v1931_v39, %v2400_v3  ;;  %v362_v42 = vpop.f32.mrb[13].mxu0 }
  0xf9   :  { %v363_v43 = vadd.f32 %v2400_v3, %v362_v42  ;;  %2014 = vmatprep.mubr.msk.f32.mxu1 %vm604_vm2, %v551_v38 }
  0xfa   :  { %2015 = vmatmul.mubr.msk.f32.gmra.mrb[8].mxu1 %vm604_vm2, %v552_v40  ;;  %v554_v46 = vmax.f32 %v368_v41, 0.0 }
  0xfb   :  { %v553_v44 = vmax.f32 %v363_v43, 0.0  ;;  %v1934_v45 = vpop.f32.mrb[14].mxu0 }
  0xfc   :  { %v378_v47 = vadd.f32 %v1934_v45, %v2400_v3  ;;  %v372_v48 = vpop.f32.mrb[15].mxu0 }
  0xfd   :  { %v373_v49 = vadd.f32 %v2400_v3, %v372_v48  ;;  %2017 = vmatprep.mubr.msk.f32.mxu1 %vm604_vm2, %v553_v44 }
  0xfe   :  { %2018 = vmatmul.mubr.msk.f32.gmra.mrb[10].mxu1 %vm604_vm2, %v554_v46  ;;  %v556_v52 = vmax.f32 %v378_v47, 0.0 }
  0xff   :  { %v555_v50 = vmax.f32 %v373_v49, 0.0  ;;  %v1937_v51 = vpop.f32.mrb[16].mxu0 }
 0x100   :  { %v388_v53 = vadd.f32 %v1937_v51, %v2400_v3  ;;  %v382_v54 = vpop.f32.mrb[17].mxu0 }
 0x101   :  { %v383_v55 = vadd.f32 %v2400_v3, %v382_v54  ;;  %2020 = vmatprep.mubr.msk.f32.mxu1 %vm604_vm2, %v555_v50 }
 0x102   :  { %2021 = vmatmul.mubr.msk.f32.gmra.mrb[12].mxu1 %vm604_vm2, %v556_v52  ;;  %v558_v58 = vmax.f32 %v388_v53, 0.0 }
 0x103   :  { %v557_v56 = vmax.f32 %v383_v55, 0.0  ;;  %v1940_v57 = vpop.f32.mrb[18].mxu0 }
 0x104   :  { %v398_v59 = vadd.f32 %v1940_v57, %v2400_v3  ;;  %v392_v60 = vpop.f32.mrb[19].mxu0 }
 0x105   :  { %v393_v61 = vadd.f32 %v2400_v3, %v392_v60  ;;  %2023 = vmatprep.mubr.msk.f32.mxu1 %vm604_vm2, %v557_v56 }
 0x106   :  { %2024 = vmatmul.mubr.msk.f32.gmra.mrb[14].mxu1 %vm604_vm2, %v558_v58  ;;  %v560_v0 = vmax.f32 %v398_v59, 0.0 }
 0x107   :  { %v559_v62 = vmax.f32 %v393_v61, 0.0  ;;  %v1943_v63 = vpop.f32.mrb[20].mxu0 }
 0x108   :  { %v408_v1 = vadd.f32 %v1943_v63, %v2400_v3  ;;  %v402_v2 = vpop.f32.mrb[21].mxu0 }
 0x109   :  { %v403_v4 = vadd.f32 %v2400_v3, %v402_v2  ;;  %2026 = vmatprep.mubr.msk.f32.mxu1 %vm604_vm2, %v559_v62 }
 0x10a   :  { %2027 = vmatmul.mubr.msk.f32.gmra.mrb[16].mxu1 %vm604_vm2, %v560_v0  ;;  %v562_v7 = vmax.f32 %v408_v1, 0.0 }
 0x10b   :  { %v561_v5 = vmax.f32 %v403_v4, 0.0  ;;  %v1946_v6 = vpop.f32.mrb[22].mxu0 }
 0x10c   :  { %v418_v8 = vadd.f32 %v1946_v6, %v2400_v3  ;;  %v412_v9 = vpop.f32.mrb[23].mxu0 }
 0x10d   :  { %v413_v10 = vadd.f32 %v2400_v3, %v412_v9  ;;  %2029 = vmatprep.mubr.msk.f32.mxu1 %vm604_vm2, %v561_v5 }
 0x10e   :  { %2030 = vmatmul.mubr.msk.f32.gmra.mrb[18].mxu1 %vm604_vm2, %v562_v7  ;;  %v564_v13 = vmax.f32 %v418_v8, 0.0 }
 0x10f   :  { %v563_v11 = vmax.f32 %v413_v10, 0.0  ;;  %v1949_v12 = vpop.f32.mrb[24].mxu0 }
 0x110   :  { %v428_v14 = vadd.f32 %v1949_v12, %v2400_v3  ;;  %v422_v15 = vpop.f32.mrb[25].mxu0 }
 0x111   :  { %v423_v16 = vadd.f32 %v2400_v3, %v422_v15  ;;  %2032 = vmatprep.mubr.msk.f32.mxu1 %vm604_vm2, %v563_v11 }
 0x112   :  { %2033 = vmatmul.mubr.msk.f32.gmra.mrb[20].mxu1 %vm604_vm2, %v564_v13  ;;  %v566_v19 = vmax.f32 %v428_v14, 0.0 }
 0x113   :  { %v565_v17 = vmax.f32 %v423_v16, 0.0  ;;  %v1952_v18 = vpop.f32.mrb[26].mxu0 }
 0x114   :  { %v438_v20 = vadd.f32 %v1952_v18, %v2400_v3  ;;  %v432_v21 = vpop.f32.mrb[27].mxu0 }
 0x115   :  { %v433_v22 = vadd.f32 %v2400_v3, %v432_v21  ;;  %2035 = vmatprep.mubr.msk.f32.mxu1 %vm604_vm2, %v565_v17 }
 0x116   :  { %2036 = vmatmul.mubr.msk.f32.gmra.mrb[22].mxu1 %vm604_vm2, %v566_v19  ;;  %v568_v25 = vmax.f32 %v438_v20, 0.0 }
 0x117   :  { %v567_v23 = vmax.f32 %v433_v22, 0.0  ;;  %v1955_v24 = vpop.f32.mrb[28].mxu0  ;;  %v2501_v22 = vld [vmem:[%s2903_s4] ss:$0 sm:$0xff]  ;;  %s2128_s4 = smov [#allocation3]  }
 0x118   :  { %v448_v26 = vadd.f32 %v1955_v24, %v2400_v3  ;;  %v442_v27 = vpop.f32.mrb[29].mxu0 }
 0x119   :  { %v443_v28 = vadd.f32 %v2400_v3, %v442_v27  ;;  %2038 = vmatprep.mubr.msk.f32.mxu1 %vm604_vm2, %v567_v23 }
 0x11a   :  { %2039 = vmatmul.mubr.msk.f32.gmra.mrb[24].mxu1 %vm604_vm2, %v568_v25  ;;  %v570_v31 = vmax.f32 %v448_v26, 0.0  ;;  %v2508_v26 = vld [vmem:[%s2904_s5] ss:$0 sm:$0xff]  ;;  %s1689_s5 = sshll.u32 %s2128_s4, 4  ;;  %s1690_s5 = int_to_ptr.vmem [resolvable:$true] %s1689_s5 }
 0x11b   :  { %v569_v29 = vmax.f32 %v443_v28, 0.0  ;;  %v1958_v30 = vpop.f32.mrb[30].mxu0  ;;  %s2103_s22 = scalar_lea.vmem %s1690_s5, 64  ;;  %p2108_p1 = scmp.lt.s32.totalorder %s1690_s5, %s1690_s5 }
 0x11c   :  { %v458_v32 = vadd.f32 %v1958_v30, %v2400_v3  ;;  %v452_v33 = vpop.f32.mrb[31].mxu0  ;;  %p2104_p0 = scmp.ne.s32.totalorder %s1690_s5, %s2103_s22  ;;  %p2109_p2 = scmp.lt.s32.totalorder %s2103_s22, %s2103_s22 }
 0x11d   :  { %v453_v34 = vadd.f32 %v2400_v3, %v452_v33  ;;  %2041 = vmatprep.mubr.msk.f32.mxu1 %vm604_vm2, %v569_v29 }
 0x11e   :  { %2042 = vmatmul.mubr.msk.f32.gmra.mrb[26].mxu1 %vm604_vm2, %v570_v31  ;;  %v572_v37 = vmax.f32 %v458_v32, 0.0  ;;  %p2110_p3 = por %p2109_p2, %p2108_p1 }
 0x11f   :  { %v571_v35 = vmax.f32 %v453_v34, 0.0  ;;  %v1961_v36 = vpop.f32.mrb[32].mxu0 }
 0x120   :  { %v468_v38 = vadd.f32 %v1961_v36, %v2400_v3  ;;  %v462_v39 = vpop.f32.mrb[33].mxu0  ;;  %p2111_p4 = pnand %p2110_p3, %p2104_p0 }
 0x121   :  { %v463_v40 = vadd.f32 %v2400_v3, %v462_v39  ;;  %2044 = vmatprep.mubr.msk.f32.mxu1 %vm604_vm2, %v571_v35 }
 0x122   :  { %2045 = vmatmul.mubr.msk.f32.gmra.mrb[28].mxu1 %vm604_vm2, %v572_v37  ;;  %v574_v43 = vmax.f32 %v468_v38, 0.0 }
 0x123   :  { %v573_v41 = vmax.f32 %v463_v40, 0.0  ;;  %v1964_v42 = vpop.f32.mrb[34].mxu0 }
 0x124   :  { %v478_v44 = vadd.f32 %v1964_v42, %v2400_v3  ;;  %v472_v45 = vpop.f32.mrb[35].mxu0 }
 0x125   :  { %v473_v46 = vadd.f32 %v2400_v3, %v472_v45  ;;  %2047 = vmatprep.mubr.msk.f32.mxu1 %vm604_vm2, %v573_v41 }
 0x126   :  { %v576_v47 = vmax.f32 %v478_v44, 0.0  ;;  %2048 = vmatmul.mubr.msk.f32.gmra.mrb[30].mxu1 %vm604_vm2, %v574_v43 }
 0x127   :  { %v575_v48 = vmax.f32 %v473_v46, 0.0  ;;  %v1967_v49 = vpop.f32.mrb[36].mxu0 }
 0x128   :  { %v488_v50 = vadd.f32 %v1967_v49, %v2400_v3  ;;  %v482_v51 = vpop.f32.mrb[37].mxu0 }
 0x129   :  { %v483_v52 = vadd.f32 %v2400_v3, %v482_v51  ;;  %2050 = vmatprep.mubr.msk.f32.mxu1 %vm604_vm2, %v575_v48 }
 0x12a   :  { %v578_v53 = vmax.f32 %v488_v50, 0.0  ;;  %2051 = vmatmul.mubr.msk.f32.gmra.mrb[32].mxu1 %vm604_vm2, %v576_v47 }
 0x12b   :  { %v577_v54 = vmax.f32 %v483_v52, 0.0  ;;  %v1970_v55 = vpop.f32.mrb[38].mxu0 }
 0x12c   :  { %v498_v56 = vadd.f32 %v1970_v55, %v2400_v3  ;;  %v492_v57 = vpop.f32.mrb[39].mxu0 }
 0x12d   :  { %v493_v58 = vadd.f32 %v2400_v3, %v492_v57  ;;  %2053 = vmatprep.mubr.msk.f32.mxu1 %vm604_vm2, %v577_v54 }
 0x12e   :  { %v580_v59 = vmax.f32 %v498_v56, 0.0  ;;  %2054 = vmatmul.mubr.msk.f32.gmra.mrb[34].mxu1 %vm604_vm2, %v578_v53 }
 0x12f   :  { %v579_v60 = vmax.f32 %v493_v58, 0.0  ;;  %v1973_v61 = vpop.f32.mrb[40].mxu0 }
 0x130   :  { %v508_v62 = vadd.f32 %v1973_v61, %v2400_v3  ;;  %v502_v63 = vpop.f32.mrb[41].mxu0 }
 0x131   :  { %v503_v0 = vadd.f32 %v2400_v3, %v502_v63  ;;  %2056 = vmatprep.mubr.msk.f32.mxu1 %vm604_vm2, %v579_v60 }
 0x132   :  { %v582_v1 = vmax.f32 %v508_v62, 0.0  ;;  %2057 = vmatmul.mubr.msk.f32.gmra.mrb[36].mxu1 %vm604_vm2, %v580_v59 }
 0x133   :  { %v581_v2 = vmax.f32 %v503_v0, 0.0  ;;  %v1976_v4 = vpop.f32.mrb[42].mxu0 }
 0x134   :  { %v518_v5 = vadd.f32 %v1976_v4, %v2400_v3  ;;  %v512_v6 = vpop.f32.mrb[43].mxu0 }
 0x135   :  { %v513_v7 = vadd.f32 %v2400_v3, %v512_v6  ;;  %2059 = vmatprep.mubr.msk.f32.mxu1 %vm604_vm2, %v581_v2 }
 0x136   :  { %v584_v8 = vmax.f32 %v518_v5, 0.0  ;;  %2060 = vmatmul.mubr.msk.f32.gmra.mrb[38].mxu1 %vm604_vm2, %v582_v1 }
 0x137   :  { %v583_v9 = vmax.f32 %v513_v7, 0.0  ;;  %v1979_v10 = vpop.f32.mrb[44].mxu0 }
 0x138   :  { %v528_v11 = vadd.f32 %v1979_v10, %v2400_v3  ;;  %v522_v12 = vpop.f32.mrb[45].mxu0 }
 0x139   :  { %v523_v13 = vadd.f32 %v2400_v3, %v522_v12  ;;  %2062 = vmatprep.mubr.msk.f32.mxu1 %vm604_vm2, %v583_v9 }
 0x13a   :  { %v586_v14 = vmax.f32 %v528_v11, 0.0  ;;  %2063 = vmatmul.mubr.msk.f32.gmra.mrb[40].mxu1 %vm604_vm2, %v584_v8 }
 0x13b   :  { %v585_v15 = vmax.f32 %v523_v13, 0.0  ;;  %v1982_v16 = vpop.f32.mrb[46].mxu0 }
 0x13c   :  { %v538_v17 = vadd.f32 %v1982_v16, %v2400_v3  ;;  %v532_v18 = vpop.f32.mrb[47].mxu0 }
 0x13d   :  { %v533_v19 = vadd.f32 %v2400_v3, %v532_v18  ;;  %2065 = vmatprep.mubr.msk.f32.mxu1 %vm604_vm2, %v585_v15 }
 0x13e   :  { %v588_v20 = vmax.f32 %v538_v17, 0.0  ;;  %2066 = vmatmul.mubr.msk.f32.gmra.mrb[42].mxu1 %vm604_vm2, %v586_v14 }
 0x13f   :  { %v587_v21 = vmax.f32 %v533_v19, 0.0 }
 0x141   :  { %2068 = vmatprep.mubr.msk.f32.mxu1 %vm604_vm2, %v587_v21 }
 0x142   :  { %2069 = vmatmul.mubr.msk.f32.gmra.mrb[44].mxu1 %vm604_vm2, %v588_v20  ;;  %vm1517_vm2 = vcmask 1048512  }
 0x1b9   :  { %v2001_v23 = vpop.f32.mrb[48].mxu0 }
 0x1ba   :  { %v821_v24 = vadd.f32 %v2001_v23, %v2501_v22  ;;  %v815_v25 = vpop.f32.mrb[49].mxu0 }
 0x1bb   :  { %v816_v3 = vadd.f32 %v2501_v22, %v815_v25 }
 0x1bc   :  { %v1055_v27 = vmax.f32 %v821_v24, 0.0 }
 0x1bd   :  { %v1054_v28 = vmax.f32 %v816_v3, 0.0  ;;  %v2004_v29 = vpop.f32.mrb[0].mxu1 }
 0x1be   :  { %v831_v30 = vadd.f32 %v2004_v29, %v2501_v22  ;;  %v825_v31 = vpop.f32.mrb[1].mxu1  ;;  %v1110_v32 = vmul.f32 %v2508_v26, %v1055_v27 }
 0x1bf   :  { %v826_v33 = vadd.f32 %v2501_v22, %v825_v31  ;;  %v1109_v36 = vmul.f32 %v2508_v26, %v1054_v28 }
 0x1c0   :  { %v1057_v34 = vmax.f32 %v831_v30, 0.0  ;;  %v1161_v35 = vsel %vm1157_vm3, %v1110_v32, 0.0 }
 0x1c1   :  { %v1056_v37 = vmax.f32 %v826_v33, 0.0  ;;  %v2007_v38 = vpop.f32.mrb[2].mxu1  ;;  %1162 = vadd.xlane.f32.xlu0 %v1161_v35  ;;  %v1158_v45 = vsel %vm1157_vm3, %v1109_v36, 0.0 }
 0x1c2   :  { %v841_v39 = vadd.f32 %v2007_v38, %v2501_v22  ;;  %v835_v40 = vpop.f32.mrb[3].mxu1  ;;  %v1112_v41 = vmul.f32 %v2508_v26, %v1057_v34 }
 0x1c3   :  { %v836_v42 = vadd.f32 %v2501_v22, %v835_v40  ;;  %v1111_v46 = vmul.f32 %v2508_v26, %v1056_v37 }
 0x1c4   :  { %v1059_v43 = vmax.f32 %v841_v39, 0.0  ;;  %v1167_v44 = vsel %vm1157_vm3, %v1112_v41, 0.0 }
 0x1c5   :  { %v1058_v47 = vmax.f32 %v836_v42, 0.0  ;;  %1168 = vadd.xlane.f32.xlu1 %v1167_v44  ;;  %v2010_v48 = vpop.f32.mrb[4].mxu1  ;;  %1159 = vadd.xlane.f32.xlu0 %v1158_v45  ;;  %v1164_v54 = vsel %vm1157_vm3, %v1111_v46, 0.0 }
 0x1c6   :  { %v851_v49 = vadd.f32 %v2010_v48, %v2501_v22  ;;  %v845_v50 = vpop.f32.mrb[5].mxu1  ;;  %v1114_v55 = vmul.f32 %v2508_v26, %v1059_v43 }
 0x1c7   :  { %v846_v51 = vadd.f32 %v2501_v22, %v845_v50  ;;  %v1113_v52 = vmul.f32 %v2508_v26, %v1058_v47 }
 0x1c8   :  { %v1061_v53 = vmax.f32 %v851_v49, 0.0  ;;  %v1173_v0 = vsel %vm1157_vm3, %v1114_v55, 0.0 }
 0x1c9   :  { %v1060_v56 = vmax.f32 %v846_v51, 0.0  ;;  %v2013_v57 = vpop.f32.mrb[6].mxu1  ;;  %1165 = vadd.xlane.f32.xlu1 %v1164_v54  ;;  %v1170_v58 = vsel %vm1157_vm3, %v1113_v52, 0.0 }
 0x1ca   :  { %v861_v59 = vadd.f32 %v2013_v57, %v2501_v22  ;;  %v855_v60 = vpop.f32.mrb[7].mxu1  ;;  %1171 = vadd.xlane.f32.xlu0 %v1170_v58  ;;  %v1116_v1 = vmul.f32 %v2508_v26, %v1061_v53 }
 0x1cb   :  { %v856_v61 = vadd.f32 %v2501_v22, %v855_v60  ;;  %v1115_v62 = vmul.f32 %v2508_v26, %v1060_v56 }
 0x1cc   :  { %v1063_v63 = vmax.f32 %v861_v59, 0.0  ;;  %v1179_v11 = vsel %vm1157_vm3, %v1116_v1, 0.0 }
 0x1cd   :  { %v1062_v2 = vmax.f32 %v856_v61, 0.0  ;;  %v2016_v4 = vpop.f32.mrb[8].mxu1  ;;  %1174 = vadd.xlane.f32.xlu1 %v1173_v0  ;;  %v1176_v5 = vsel %vm1157_vm3, %v1115_v62, 0.0 }
 0x1ce   :  { %v871_v6 = vadd.f32 %v2016_v4, %v2501_v22  ;;  %v865_v7 = vpop.f32.mrb[9].mxu1  ;;  %1177 = vadd.xlane.f32.xlu0 %v1176_v5  ;;  %v1118_v12 = vmul.f32 %v2508_v26, %v1063_v63 }
 0x1cf   :  { %v866_v8 = vadd.f32 %v2501_v22, %v865_v7  ;;  %v1117_v9 = vmul.f32 %v2508_v26, %v1062_v2 }
 0x1d0   :  { %v1065_v10 = vmax.f32 %v871_v6, 0.0  ;;  %v1185_v18 = vsel %vm1157_vm3, %v1118_v12, 0.0 }
 0x1d1   :  { %v1064_v13 = vmax.f32 %v866_v8, 0.0  ;;  %v2538_v14 = vpop.f32.mrb[10].mxu1  ;;  %1180 = vadd.xlane.f32.xlu1 %v1179_v11  ;;  %v1182_v15 = vsel %vm1157_vm3, %v1117_v9, 0.0 }
 0x1d2   :  { %v2541_v16 = vpop.f32.mrb[11].mxu1  ;;  %1183 = vadd.xlane.f32.xlu0 %v1182_v15  ;;  %v1120_v19 = vmul.f32 %v2508_v26, %v1065_v10 }
 0x1d3   :  { %v1119_v17 = vmul.f32 %v2508_v26, %v1064_v13 }
 0x1d4   :  { %v1191_v24 = vsel %vm1157_vm3, %v1120_v19, 0.0 }
 0x1d5   :  { %v2546_v20 = vpop.f32.mrb[12].mxu1  ;;  %1186 = vadd.xlane.f32.xlu1 %v1185_v18  ;;  %v1188_v21 = vsel %vm1157_vm3, %v1119_v17, 0.0 }
 0x1d6   :  { %v2549_v23 = vpop.f32.mrb[13].mxu1  ;;  %1189 = vadd.xlane.f32.xlu0 %v1188_v21 }
 0x1d9   :  { %v2025_v25 = vpop.f32.mrb[14].mxu1  ;;  %1192 = vadd.xlane.f32.xlu1 %v1191_v24 }
 0x1da   :  { %v901_v3 = vadd.f32 %v2025_v25, %v2501_v22  ;;  %v895_v27 = vpop.f32.mrb[15].mxu1 }
 0x1db   :  { %v896_v28 = vadd.f32 %v2501_v22, %v895_v27 }
 0x1dc   :  { %v1071_v29 = vmax.f32 %v901_v3, 0.0  ;;  %v876_v3 = vadd.f32 %v2501_v22, %v2541_v16 }
 0x1dd   :  { %v1070_v30 = vmax.f32 %v896_v28, 0.0  ;;  %v2028_v31 = vpop.f32.mrb[16].mxu1 }
 0x1de   :  { %v911_v32 = vadd.f32 %v2028_v31, %v2501_v22  ;;  %v905_v33 = vpop.f32.mrb[17].mxu1  ;;  %v1126_v34 = vmul.f32 %v2508_v26, %v1071_v29 }
 0x1df   :  { %v906_v35 = vadd.f32 %v2501_v22, %v905_v33  ;;  %v1125_v36 = vmul.f32 %v2508_v26, %v1070_v30  ;;  %v1066_v33 = vmax.f32 %v876_v3, 0.0 }
 0x1e0   :  { %v1073_v37 = vmax.f32 %v911_v32, 0.0  ;;  %v1209_v38 = vsel %vm1157_vm3, %v1126_v34, 0.0 }
 0x1e1   :  { %v1072_v39 = vmax.f32 %v906_v35, 0.0  ;;  %v2031_v40 = vpop.f32.mrb[18].mxu1  ;;  %1210 = vadd.xlane.f32.xlu1 %v1209_v38  ;;  %v1206_v41 = vsel %vm1157_vm3, %v1125_v36, 0.0 }
 0x1e2   :  { %v921_v42 = vadd.f32 %v2031_v40, %v2501_v22  ;;  %v915_v43 = vpop.f32.mrb[19].mxu1  ;;  %1207 = vadd.xlane.f32.xlu0 %v1206_v41  ;;  %v1128_v44 = vmul.f32 %v2508_v26, %v1073_v37 }
 0x1e3   :  { %v916_v45 = vadd.f32 %v2501_v22, %v915_v43  ;;  %v1127_v46 = vmul.f32 %v2508_v26, %v1072_v39 }
 0x1e4   :  { %v1075_v47 = vmax.f32 %v921_v42, 0.0  ;;  %v1215_v48 = vsel %vm1157_vm3, %v1128_v44, 0.0  ;;  %v881_v42 = vadd.f32 %v2538_v14, %v2501_v22 }
 0x1e5   :  { %v1074_v49 = vmax.f32 %v916_v45, 0.0  ;;  %v2034_v50 = vpop.f32.mrb[20].mxu1  ;;  %1216 = vadd.xlane.f32.xlu1 %v1215_v48  ;;  %v1212_v51 = vsel %vm1157_vm3, %v1127_v46, 0.0  ;;  %v1121_v45 = vmul.f32 %v2508_v26, %v1066_v33 }
 0x1e6   :  { %v931_v52 = vadd.f32 %v2034_v50, %v2501_v22  ;;  %v925_v53 = vpop.f32.mrb[21].mxu1  ;;  %1213 = vadd.xlane.f32.xlu0 %v1212_v51  ;;  %v1130_v54 = vmul.f32 %v2508_v26, %v1075_v47  ;;  %v1067_v51 = vmax.f32 %v881_v42, 0.0 }
 0x1e7   :  { %v926_v55 = vadd.f32 %v2501_v22, %v925_v53  ;;  %v1129_v58 = vmul.f32 %v2508_v26, %v1074_v49  ;;  %v1194_v53 = vsel %vm1157_vm3, %v1121_v45, 0.0 }
 0x1e8   :  { %v1077_v56 = vmax.f32 %v931_v52, 0.0  ;;  %v1221_v57 = vsel %vm1157_vm3, %v1130_v54, 0.0 }
 0x1e9   :  { %v2037_v59 = vpop.f32.mrb[22].mxu1  ;;  %1222 = vadd.xlane.f32.xlu1 %v1221_v57  ;;  %v1076_v62 = vmax.f32 %v926_v55, 0.0  ;;  %v1218_v1 = vsel %vm1157_vm3, %v1129_v58, 0.0  ;;  %v886_v58 = vadd.f32 %v2501_v22, %v2549_v23 }
 0x1ea   :  { %v941_v60 = vadd.f32 %v2037_v59, %v2501_v22  ;;  %v935_v61 = vpop.f32.mrb[23].mxu1  ;;  %v1132_v2 = vmul.f32 %v2508_v26, %v1077_v56 }
 0x1eb   :  { %v936_v0 = vadd.f32 %v2501_v22, %v935_v61  ;;  %v1131_v11 = vmul.f32 %v2508_v26, %v1076_v62  ;;  %v1122_v61 = vmul.f32 %v2508_v26, %v1067_v51 }
 0x1ec   :  { %v1079_v63 = vmax.f32 %v941_v60, 0.0  ;;  %v1227_v9 = vsel %vm1157_vm3, %v1132_v2, 0.0  ;;  %v1068_v2 = vmax.f32 %v886_v58, 0.0 }
 0x1ed   :  { %v2040_v4 = vpop.f32.mrb[24].mxu1  ;;  %1219 = vadd.xlane.f32.xlu1 %v1218_v1  ;;  %v1078_v8 = vmax.f32 %v936_v0, 0.0  ;;  %v1224_v18 = vsel %vm1157_vm3, %v1131_v11, 0.0 }
 0x1ee   :  { %v945_v5 = vpop.f32.mrb[25].mxu1  ;;  %v1134_v6 = vmul.f32 %v2508_v26, %v1079_v63  ;;  %v951_v28 = vadd.f32 %v2040_v4, %v2501_v22  ;;  %v1197_v4 = vsel %vm1157_vm3, %v1122_v61, 0.0 }
 0x1ef   :  { %v946_v7 = vadd.f32 %v2501_v22, %v945_v5  ;;  %v1133_v19 = vmul.f32 %v2508_v26, %v1078_v8 }
 0x1f0   :  { %v1233_v10 = vsel %vm1157_vm3, %v1134_v6, 0.0  ;;  %v1081_v36 = vmax.f32 %v951_v28, 0.0 }
 0x1f1   :  { %v1080_v12 = vmax.f32 %v946_v7, 0.0  ;;  %v2043_v13 = vpop.f32.mrb[26].mxu1  ;;  %1228 = vadd.xlane.f32.xlu1 %v1227_v9  ;;  %1234 = vadd.xlane.f32.xlu0 %v1233_v10  ;;  %v1230_v27 = vsel %vm1157_vm3, %v1133_v19, 0.0  ;;  %v891_v7 = vadd.f32 %v2546_v20, %v2501_v22  ;;  %v1123_v10 = vmul.f32 %v2508_v26, %v1068_v2 }
 0x1f2   :  { %v955_v15 = vpop.f32.mrb[27].mxu1  ;;  %v1136_v48 = vmul.f32 %v2508_v26, %v1081_v36  ;;  %v961_v52 = vadd.f32 %v2043_v13, %v2501_v22 }
 0x1f3   :  { %v1135_v17 = vmul.f32 %v2508_v26, %v1080_v12  ;;  %v956_v34 = vadd.f32 %v2501_v22, %v955_v15  ;;  %v1069_v15 = vmax.f32 %v891_v7, 0.0 }
 0x1f4   :  { %v1239_v54 = vsel %vm1157_vm3, %v1136_v48, 0.0  ;;  %v1083_v59 = vmax.f32 %v961_v52, 0.0 }
 0x1f5   :  { %v2046_v21 = vpop.f32.mrb[28].mxu1  ;;  %1225 = vadd.xlane.f32.xlu1 %v1224_v18  ;;  %v1236_v24 = vsel %vm1157_vm3, %v1135_v17, 0.0  ;;  %v1082_v43 = vmax.f32 %v956_v34, 0.0  ;;  %v1124_v28 = vmul.f32 %v2508_v26, %v1069_v15 }
 0x1f6   :  { %v965_v25 = vpop.f32.mrb[29].mxu1  ;;  %1237 = vadd.xlane.f32.xlu0 %v1236_v24  ;;  %v971_v37 = vadd.f32 %v2046_v21, %v2501_v22  ;;  %v1138_v5 = vmul.f32 %v2508_v26, %v1083_v59  ;;  %v1200_v21 = vsel %vm1157_vm3, %v1123_v10, 0.0 }
 0x1f7   :  { %v1137_v14 = vmul.f32 %v2508_v26, %v1082_v43  ;;  %v966_v1 = vadd.f32 %v2501_v22, %v965_v25  ;;  %v1203_v34 = vsel %vm1157_vm3, %v1124_v28, 0.0 }
 0x1f8   :  { %v1085_v46 = vmax.f32 %v971_v37, 0.0  ;;  %v1245_v9 = vsel %vm1157_vm3, %v1138_v5, 0.0 }
 0x1f9   :  { %v2049_v29 = vpop.f32.mrb[30].mxu1  ;;  %1231 = vadd.xlane.f32.xlu1 %v1230_v27  ;;  %v1242_v60 = vsel %vm1157_vm3, %v1137_v14, 0.0  ;;  %v1084_v8 = vmax.f32 %v966_v1, 0.0 }
 0x1fa   :  { %v981_v30 = vadd.f32 %v2049_v29, %v2501_v22  ;;  %v975_v31 = vpop.f32.mrb[31].mxu1  ;;  %v1140_v55 = vmul.f32 %v2508_v26, %v1085_v46 }
 0x1fb   :  { %v976_v32 = vadd.f32 %v2501_v22, %v975_v31  ;;  %v1139_v17 = vmul.f32 %v2508_v26, %v1084_v8 }
 0x1fc   :  { %v1087_v35 = vmax.f32 %v981_v30, 0.0  ;;  %v1251_v62 = vsel %vm1157_vm3, %v1140_v55, 0.0 }
 0x1fd   :  { %v1086_v38 = vmax.f32 %v976_v32, 0.0  ;;  %v2052_v16 = vpop.f32.mrb[32].mxu1  ;;  %v1248_v27 = vsel %vm1157_vm3, %v1139_v17, 0.0 }
 0x1fe   :  { %v1142_v39 = vmul.f32 %v2508_v26, %v1087_v35  ;;  %v985_v40 = vpop.f32.mrb[33].mxu1  ;;  %v991_v18 = vadd.f32 %v2052_v16, %v2501_v22 }
 0x1ff   :  { %v1141_v41 = vmul.f32 %v2508_v26, %v1086_v38  ;;  %v986_v30 = vadd.f32 %v2501_v22, %v985_v40 }
 0x200   :  { %v1257_v44 = vsel %vm1157_vm3, %v1142_v39, 0.0  ;;  %v1089_v29 = vmax.f32 %v991_v18, 0.0 }
 0x201   :  { %1258 = vadd.xlane.f32.xlu0 %v1257_v44  ;;  %v1254_v47 = vsel %vm1157_vm3, %v1141_v41, 0.0  ;;  %v2055_v49 = vpop.f32.mrb[34].mxu1  ;;  %v1088_v35 = vmax.f32 %v986_v30, 0.0 }
 0x202   :  { %1255 = vadd.xlane.f32.xlu1 %v1254_v47  ;;  %v995_v50 = vpop.f32.mrb[35].mxu1  ;;  %v1001_v36 = vadd.f32 %v2055_v49, %v2501_v22  ;;  %v1144_v38 = vmul.f32 %v2508_v26, %v1089_v29 }
 0x203   :  { %v996_v39 = vadd.f32 %v2501_v22, %v995_v50  ;;  %v1143_v41 = vmul.f32 %v2508_v26, %v1088_v35 }
 0x204   :  { %v1091_v16 = vmax.f32 %v1001_v36, 0.0  ;;  %v1263_v40 = vsel %vm1157_vm3, %v1144_v38, 0.0 }
 0x205   :  { %1195 = vadd.xlane.f32.xlu0 %v1194_v53  ;;  %v2058_v56 = vpop.f32.mrb[36].mxu1  ;;  %v1090_v42 = vmax.f32 %v996_v39, 0.0  ;;  %v1260_v44 = vsel %vm1157_vm3, %v1143_v41, 0.0 }
 0x206   :  { %1240 = vadd.xlane.f32.xlu1 %v1239_v54  ;;  %v1005_v57 = vpop.f32.mrb[37].mxu1  ;;  %v1011_v43 = vadd.f32 %v2058_v56, %v2501_v22  ;;  %v1146_v45 = vmul.f32 %v2508_v26, %v1091_v16 }
 0x207   :  { %v1006_v47 = vadd.f32 %v2501_v22, %v1005_v57  ;;  %v1145_v49 = vmul.f32 %v2508_v26, %v1090_v42 }
 0x208   :  { %v1093_v46 = vmax.f32 %v1011_v43, 0.0  ;;  %v1269_v48 = vsel %vm1157_vm3, %v1146_v45, 0.0 }
 0x209   :  { %1243 = vadd.xlane.f32.xlu0 %v1242_v60  ;;  %v2061_v63 = vpop.f32.mrb[38].mxu1  ;;  %v1092_v50 = vmax.f32 %v1006_v47, 0.0  ;;  %v1266_v52 = vsel %vm1157_vm3, %v1145_v49, 0.0 }
 0x20a   :  { %1252 = vadd.xlane.f32.xlu1 %v1251_v62  ;;  %v2610_v0 = vpop.f32.mrb[39].mxu1  ;;  %v1021_v51 = vadd.f32 %v2061_v63, %v2501_v22  ;;  %v1148_v53 = vmul.f32 %v2508_v26, %v1093_v46 }
 0x20b   :  { %v1016_v54 = vadd.f32 %v2501_v22, %v2610_v0  ;;  %v1147_v56 = vmul.f32 %v2508_v26, %v1092_v50 }
 0x20c   :  { %v1095_v14 = vmax.f32 %v1021_v51, 0.0  ;;  %v1275_v55 = vsel %vm1157_vm3, %v1148_v53, 0.0 }
 0x20d   :  { %1198 = vadd.xlane.f32.xlu0 %v1197_v4  ;;  %v2064_v23 = vpop.f32.mrb[40].mxu1  ;;  %v1094_v57 = vmax.f32 %v1016_v54, 0.0  ;;  %v1272_v59 = vsel %vm1157_vm3, %v1147_v56, 0.0 }
 0x20e   :  { %v2615_v6 = vpop.f32.mrb[41].mxu1  ;;  %v1031_v58 = vadd.f32 %v2064_v23, %v2501_v22  ;;  %v1150_v60 = vmul.f32 %v2508_v26, %v1095_v14 }
 0x20f   :  { %v1026_v62 = vadd.f32 %v2501_v22, %v2615_v6  ;;  %v1149_v0 = vmul.f32 %v2508_v26, %v1094_v57 }
 0x210   :  { %v1097_v61 = vmax.f32 %v1031_v58, 0.0  ;;  %v1281_v63 = vsel %vm1157_vm3, %v1150_v60, 0.0 }
 0x211   :  { %v2067_v11 = vpop.f32.mrb[42].mxu1  ;;  %1246 = vadd.xlane.f32.xlu0 %v1245_v9  ;;  %v1096_v1 = vmax.f32 %v1026_v62, 0.0  ;;  %v1278_v4 = vsel %vm1157_vm3, %v1149_v0, 0.0 }
 0x212   :  { %v1041_v12 = vadd.f32 %v2067_v11, %v2501_v22  ;;  %v2622_v13 = vpop.f32.mrb[43].mxu1  ;;  %v1152_v5 = vmul.f32 %v2508_v26, %v1097_v61 }
 0x213   :  { %v1036_v2 = vadd.f32 %v2501_v22, %v2622_v13  ;;  %v1151_v6 = vmul.f32 %v2508_v26, %v1096_v1 }
 0x214   :  { %v1099_v19 = vmax.f32 %v1041_v12, 0.0  ;;  %v1287_v7 = vsel %vm1157_vm3, %v1152_v5, 0.0  ;;  %v1408_v12 = vlaneseq }
 0x215   :  { %v2070_v20 = vpop.f32.mrb[44].mxu1  ;;  %1201 = vadd.xlane.f32.xlu0 %v1200_v21  ;;  %v1098_v23 = vmax.f32 %v1036_v2, 0.0  ;;  %v1284_v10 = vsel %vm1157_vm3, %v1151_v6, 0.0 }
 0x216   :  { %v1051_v24 = vadd.f32 %v2070_v20, %v2501_v22  ;;  %v1154_v25 = vmul.f32 %v2508_v26, %v1099_v19  ;;  %v1045_v3 = vpop.f32.mrb[45].mxu1  ;;  %v2672_v17 = vand.u32 127, %v1408_v12  ;;  %v2677_v19 = vshrl.u32 %v1408_v12, 7 }
 0x217   :  { %v1046_v8 = vadd.f32 %v2501_v22, %v1045_v3  ;;  %v1153_v11 = vmul.f32 %v2508_v26, %v1098_v23  ;;  %v2675_v22 = vpop.permute.xlu1 %1309 }
 0x218   :  { %v1101_v31 = vmax.f32 %v1051_v24, 0.0  ;;  %v1293_v32 = vsel %vm1157_vm3, %v1154_v25, 0.0  ;;  %v1414_v21 = vadd.s32 4294967288, %v2672_v17  ;;  %v1421_v3 = vadd.s32 4294967280, %v2672_v17 }
 0x219   :  { %1294 = vadd.xlane.f32.xlu1 %v1293_v32  ;;  %1249 = vadd.xlane.f32.xlu0 %v1248_v27  ;;  %v1100_v9 = vmax.f32 %v1046_v8, 0.0  ;;  %v1290_v13 = vsel %vm1157_vm3, %v1153_v11, 0.0  ;;  %v1428_v27 = vadd.s32 4294967272, %v2672_v17  ;;  %v1435_v30 = vadd.s32 4294967264, %v2672_v17 }
 0x21a   :  { %v1156_v33 = vmul.f32 %v2508_v26, %v1101_v31  ;;  %v2681_v24 = vsub.s32 %v1414_v21, %v2677_v19  ;;  %v1442_v35 = vadd.s32 4294967256, %v2672_v17  ;;  %v1449_v39 = vadd.s32 4294967248, %v2672_v17 }
 0x21b   :  { %v1155_v15 = vmul.f32 %v2508_v26, %v1100_v9  ;;  %v2686_v26 = vsub.s32 %v2672_v17, %v2677_v19  ;;  %v2699_v36 = vsub.s32 %v1428_v27, %v2677_v19  ;;  %v2703_v16 = vsub.s32 %v1435_v30, %v2677_v19 }
 0x21c   :  { %v1299_v37 = vsel %vm1157_vm3, %v1156_v33, 0.0  ;;  %v2711_v45 = vsub.s32 %v1442_v35, %v2677_v19  ;;  %v1456_v46 = vadd.s32 4294967240, %v2672_v17  ;;  %v2717_v50 = vsub.s32 %v1449_v39, %v2677_v19 }
 0x21d   :  { %1300 = vadd.xlane.f32.xlu1 %v1299_v37  ;;  %1204 = vadd.xlane.f32.xlu0 %v1203_v34  ;;  %v1296_v18 = vsel %vm1157_vm3, %v1155_v15, 0.0  ;;  %v2695_v34 = vsub.s32 %v1421_v3, %v2677_v19  ;;  %v1463_v51 = vadd.s32 4294967232, %v2672_v17  ;;  %vm1677_vm3 = vcmask 1041409  }
 0x21e   :  { %v2727_v58 = vsub.s32 %v1456_v46, %v2677_v19 }
 0x21f   :  { %v2732_v62 = vsub.s32 %v1463_v51, %v2677_v19 }
 0x221   :  { %1264 = vadd.xlane.f32.xlu0 %v1263_v40 }
 0x225   :  { %1261 = vadd.xlane.f32.xlu0 %v1260_v44 }
 0x229   :  { %1270 = vadd.xlane.f32.xlu0 %v1269_v48 }
 0x22d   :  { %1267 = vadd.xlane.f32.xlu0 %v1266_v52 }
 0x231   :  { %1276 = vadd.xlane.f32.xlu0 %v1275_v55 }
 0x235   :  { %1273 = vadd.xlane.f32.xlu0 %v1272_v59  ;;  %v1470_v59 = vadd.s32 4294967224, %v2672_v17 }
 0x239   :  { %1282 = vadd.xlane.f32.xlu0 %v1281_v63  ;;  %v1477_v63 = vadd.s32 4294967216, %v2672_v17 }
 0x23b   :  { %v2745_v9 = vsub.s32 %v1477_v63, %v2677_v19 }
 0x23d   :  { %1279 = vadd.xlane.f32.xlu0 %v1278_v4 }
 0x241   :  { %1288 = vadd.xlane.f32.xlu0 %v1287_v7  ;;  %v2741_v7 = vsub.s32 %v1470_v59, %v2677_v19 }
 0x245   :  { %1285 = vadd.xlane.f32.xlu0 %v1284_v10 }
 0x249   :  { %1291 = vadd.xlane.f32.xlu0 %v1290_v13 }
 0x24d   :  { %1297 = vadd.xlane.f32.xlu0 %v1296_v18 }
 0x24e   :  { %v1163_v20 = vpop.xlane.xlu0 %1162 }
 0x24f   :  { %v1313_v25 = vadd.f32 %v2675_v22, %v1163_v20 }
 0x251   :  { %v1418_v32 = vrot.slane %v1313_v25, %v2681_v24 }
 0x252   :  { %v1169_v28 = vpop.xlane.xlu1 %1168  ;;  %v1160_v29 = vpop.xlane.xlu0 %1159 }
 0x253   :  { %v1312_v31 = vadd.f32 %v2675_v22, %v1160_v29  ;;  %v1315_v37 = vadd.f32 %v2675_v22, %v1169_v28 }
 0x255   :  { %v1413_v33 = vrot.slane %v1312_v31, %v2686_v26  ;;  %v1432_v47 = vrot.slane %v1315_v37, %v2699_v36 }
 0x256   :  { %v1166_v38 = vpop.xlane.xlu1 %1165 }
 0x257   :  { %v1420_v40 = vsel %vm1419_vm4, %v1418_v32, %v1413_v33  ;;  %v1314_v41 = vadd.f32 %v2675_v22, %v1166_v38  ;;  %v1172_v42 = vpop.xlane.xlu0 %1171 }
 0x258   :  { %v1316_v43 = vadd.f32 %v2675_v22, %v1172_v42 }
 0x259   :  { %v1425_v44 = vrot.slane %v1314_v41, %v2695_v34 }
 0x25a   :  { %v1439_v48 = vrot.slane %v1316_v43, %v2703_v16  ;;  %v1175_v49 = vpop.xlane.xlu1 %1174 }
 0x25b   :  { %v1427_v52 = vsel %vm1426_vm5, %v1425_v44, %v1420_v40  ;;  %v1317_v53 = vadd.f32 %v2675_v22, %v1175_v49  ;;  %v1178_v14 = vpop.xlane.xlu0 %1177 }
 0x25c   :  { %v1434_v54 = vsel %vm1433_vm6, %v1432_v47, %v1427_v52  ;;  %v1318_v55 = vadd.f32 %v2675_v22, %v1178_v14 }
 0x25d   :  { %v1441_v56 = vsel %vm1440_vm7, %v1439_v48, %v1434_v54  ;;  %v1446_v57 = vrot.slane %v1317_v53, %v2711_v45 }
 0x25e   :  { %v1453_v60 = vrot.slane %v1318_v55, %v2717_v50  ;;  %v1181_v61 = vpop.xlane.xlu1 %1180 }
 0x25f   :  { %v1448_v0 = vsel %vm1447_vm8, %v1446_v57, %v1441_v56  ;;  %v1319_v1 = vadd.f32 %v2675_v22, %v1181_v61  ;;  %v1184_v2 = vpop.xlane.xlu0 %1183 }
 0x260   :  { %v1455_v4 = vsel %vm1454_vm9, %v1453_v60, %v1448_v0  ;;  %v1320_v5 = vadd.f32 %v2675_v22, %v1184_v2 }
 0x261   :  { %v1460_v23 = vrot.slane %v1319_v1, %v2727_v58 }
 0x262   :  { %v1467_v8 = vrot.slane %v1320_v5, %v2732_v62  ;;  %v1187_v6 = vpop.xlane.xlu1 %1186 }
 0x263   :  { %v1462_v10 = vsel %vm1461_vm10, %v1460_v23, %v1455_v4  ;;  %v1321_v11 = vadd.f32 %v2675_v22, %v1187_v6  ;;  %v1190_v12 = vpop.xlane.xlu0 %1189  ;;  %v1484_v23 = vadd.s32 4294967208, %v2672_v17 }
 0x264   :  { %v1469_v13 = vsel %vm1468_vm11, %v1467_v8, %v1462_v10  ;;  %v1322_v15 = vadd.f32 %v2675_v22, %v1190_v12 }
 0x265   :  { %v1474_v18 = vrot.slane %v1321_v11, %v2741_v7 }
 0x266   :  { %v1481_v21 = vrot.slane %v1322_v15, %v2745_v9  ;;  %v1193_v3 = vpop.xlane.xlu1 %1192 }
 0x267   :  { %v1476_v20 = vsel %vm1475_vm12, %v1474_v18, %v1469_v13  ;;  %v1491_v13 = vadd.s32 4294967200, %v2672_v17  ;;  %v2790_v18 = vsub.s32 %v1484_v23, %v2677_v19 }
 0x268   :  { %v1483_v25 = vsel %vm1482_vm13, %v1481_v21, %v1476_v20  ;;  %v1323_v21 = vadd.f32 %v2675_v22, %v1193_v3 }
 0x26e   :  { %v1211_v27 = vpop.xlane.xlu1 %1210 }
 0x26f   :  { %v1329_v28 = vadd.f32 %v2675_v22, %v1211_v27  ;;  %v1208_v29 = vpop.xlane.xlu0 %1207 }
 0x270   :  { %v1328_v30 = vadd.f32 %v2675_v22, %v1208_v29  ;;  %v1488_v29 = vrot.slane %v1323_v21, %v2790_v18 }
 0x271   :  { %v1526_v32 = vrot.slane %v1329_v28, %v2681_v24  ;;  %v2794_v28 = vsub.s32 %v1491_v13, %v2677_v19 }
 0x272   :  { %v1217_v31 = vpop.xlane.xlu1 %1216  ;;  %v1522_v33 = vrot.slane %v1328_v30, %v2686_v26 }
 0x273   :  { %v1214_v35 = vpop.xlane.xlu0 %1213  ;;  %v1331_v44 = vadd.f32 %v2675_v22, %v1217_v31 }
 0x274   :  { %v1330_v37 = vadd.f32 %v2675_v22, %v1214_v35  ;;  %v1527_v40 = vsel %vm1419_vm4, %v1526_v32, %v1522_v33 }
 0x275   :  { %v1536_v49 = vrot.slane %v1331_v44, %v2699_v36 }
 0x276   :  { %v1531_v38 = vrot.slane %v1330_v37, %v2695_v34  ;;  %v1223_v39 = vpop.xlane.xlu1 %1222  ;;  %v1490_v37 = vsel %vm1489_vm14, %v1488_v29, %v1483_v25 }
 0x277   :  { %v1333_v51 = vadd.f32 %v2675_v22, %v1223_v39 }
 0x278   :  { %v1532_v41 = vsel %vm1426_vm5, %v1531_v38, %v1527_v40 }
 0x279   :  { %v1537_v52 = vsel %vm1433_vm6, %v1536_v49, %v1532_v41  ;;  %v1546_v55 = vrot.slane %v1333_v51, %v2711_v45  ;;  %v1512_v51 = vadd.s32 4294967176, %v2672_v17 }
 0x27a   :  { %v1220_v42 = vpop.xlane.xlu1 %1219 }
 0x27b   :  { %v1332_v43 = vadd.f32 %v2675_v22, %v1220_v42 }
 0x27d   :  { %v1541_v48 = vrot.slane %v1332_v43, %v2703_v16 }
 0x27e   :  { %v1229_v46 = vpop.xlane.xlu1 %1228  ;;  %v1235_v47 = vpop.xlane.xlu0 %1234 }
 0x27f   :  { %v1542_v14 = vsel %vm1440_vm7, %v1541_v48, %v1537_v52  ;;  %v1335_v56 = vadd.f32 %v2675_v22, %v1229_v46  ;;  %v1337_v60 = vadd.f32 %v2675_v22, %v1235_v47  ;;  %v1498_v47 = vadd.s32 4294967192, %v2672_v17 }
 0x280   :  { %v1547_v61 = vsel %vm1447_vm8, %v1546_v55, %v1542_v14  ;;  %v1505_v48 = vadd.s32 4294967184, %v2672_v17 }
 0x281   :  { %v1556_v4 = vrot.slane %v1335_v56, %v2727_v58  ;;  %v1566_v8 = vrot.slane %v1337_v60, %v2741_v7  ;;  %v2812_v52 = vsub.s32 %v1498_v47, %v2677_v19  ;;  %v2822_v60 = vsub.s32 %v1512_v51, %v2677_v19 }
 0x282   :  { %v1226_v53 = vpop.xlane.xlu1 %1225 }
 0x283   :  { %v1334_v54 = vadd.f32 %v2675_v22, %v1226_v53  ;;  %v1238_v57 = vpop.xlane.xlu0 %1237 }
 0x284   :  { %v1338_v1 = vadd.f32 %v2675_v22, %v1238_v57 }
 0x285   :  { %v1551_v59 = vrot.slane %v1334_v54, %v2717_v50  ;;  %v2816_v54 = vsub.s32 %v1505_v48, %v2677_v19 }
 0x286   :  { %v1232_v63 = vpop.xlane.xlu1 %1231  ;;  %v1571_v10 = vrot.slane %v1338_v1, %v2745_v9 }
 0x287   :  { %v1552_v0 = vsel %vm1454_vm9, %v1551_v59, %v1547_v61  ;;  %v1336_v2 = vadd.f32 %v2675_v22, %v1232_v63 }
 0x288   :  { %v1557_v6 = vsel %vm1461_vm10, %v1556_v4, %v1552_v0 }
 0x289   :  { %v1561_v5 = vrot.slane %v1336_v2, %v2732_v62 }
 0x28b   :  { %v1562_v11 = vsel %vm1468_vm11, %v1561_v5, %v1557_v6 }
 0x28c   :  { %v1567_v12 = vsel %vm1475_vm12, %v1566_v8, %v1562_v11 }
 0x28d   :  { %v1572_v15 = vsel %vm1482_vm13, %v1571_v10, %v1567_v12 }
 0x28e   :  { %v1259_v20 = vpop.xlane.xlu0 %1258 }
 0x28f   :  { %v1256_v27 = vpop.xlane.xlu1 %1255 }
 0x292   :  { %v1196_v30 = vpop.xlane.xlu0 %1195 }
 0x293   :  { %v1324_v31 = vadd.f32 %v2675_v22, %v1196_v30  ;;  %v1241_v32 = vpop.xlane.xlu1 %1240  ;;  %v1345_v30 = vadd.f32 %v2675_v22, %v1259_v20 }
 0x294   :  { %v1339_v33 = vadd.f32 %v2675_v22, %v1241_v32 }
 0x295   :  { %v1495_v35 = vrot.slane %v1324_v31, %v2794_v28  ;;  %v1344_v31 = vadd.f32 %v2675_v22, %v1256_v27 }
 0x296   :  { %v1576_v3 = vrot.slane %v1339_v33, %v2790_v18  ;;  %v1244_v38 = vpop.xlane.xlu0 %1243 }
 0x297   :  { %v1497_v39 = vsel %vm1496_vm15, %v1495_v35, %v1490_v37  ;;  %v1340_v40 = vadd.f32 %v2675_v22, %v1244_v38  ;;  %v1253_v14 = vpop.xlane.xlu1 %1252  ;;  %v1605_v35 = vrot.slane %v1345_v30, %v2681_v24  ;;  %v1601_v37 = vrot.slane %v1344_v31, %v2686_v26 }
 0x298   :  { %v1577_v42 = vsel %vm1489_vm14, %v1576_v3, %v1572_v15  ;;  %v1343_v17 = vadd.f32 %v2675_v22, %v1253_v14 }
 0x299   :  { %v1581_v41 = vrot.slane %v1340_v40, %v2794_v28 }
 0x29a   :  { %v1199_v43 = vpop.xlane.xlu0 %1198  ;;  %v1596_v19 = vrot.slane %v1343_v17, %v2822_v60 }
 0x29b   :  { %v1582_v44 = vsel %vm1496_vm15, %v1581_v41, %v1577_v42  ;;  %v1325_v53 = vadd.f32 %v2675_v22, %v1199_v43  ;;  %v1606_v41 = vsel %vm1419_vm4, %v1605_v35, %v1601_v37  ;;  %vm1679_vm4 = vcmask 1042434  }
 0x29d   :  { %v1502_v61 = vrot.slane %v1325_v53, %v2812_v52 }
 0x29e   :  { %v1247_v46 = vpop.xlane.xlu0 %1246 }
 0x29f   :  { %v1341_v49 = vadd.f32 %v2675_v22, %v1247_v46  ;;  %v1504_v23 = vsel %vm1503_vm0, %v1502_v61, %v1497_v39 }
 0x2a1   :  { %v1586_v57 = vrot.slane %v1341_v49, %v2812_v52 }
 0x2a2   :  { %v1202_v25 = vpop.xlane.xlu0 %1201 }
 0x2a3   :  { %v1326_v55 = vadd.f32 %v2675_v22, %v1202_v25  ;;  %v1587_v2 = vsel %vm1503_vm0, %v1586_v57, %v1582_v44 }
 0x2a5   :  { %v1509_v0 = vrot.slane %v1326_v55, %v2816_v54 }
 0x2a6   :  { %v1250_v56 = vpop.xlane.xlu0 %1249 }
 0x2a7   :  { %v1342_v59 = vadd.f32 %v2675_v22, %v1250_v56  ;;  %v1511_v6 = vsel %vm1510_vm1, %v1509_v0, %v1504_v23  ;;  %v1295_v56 = vpop.xlane.xlu1 %1294 }
 0x2a9   :  { %v1591_v63 = vrot.slane %v1342_v59, %v2816_v54 }
 0x2aa   :  { %v1205_v1 = vpop.xlane.xlu0 %1204 }
 0x2ab   :  { %v1327_v4 = vadd.f32 %v2675_v22, %v1205_v1  ;;  %v1592_v5 = vsel %vm1510_vm1, %v1591_v63, %v1587_v2 }
 0x2ac   :  { %v1597_v12 = vsel %vm1517_vm2, %v1596_v19, %v1592_v5 }
 0x2ad   :  { %v1516_v8 = vrot.slane %v1327_v4, %v2822_v60  ;;  %v1357_v4 = vadd.f32 %v2675_v22, %v1295_v56 }
 0x2ae   :  { %v1265_v10 = vpop.xlane.xlu0 %1264 }
 0x2af   :  { %v1518_v11 = vsel %vm1517_vm2, %v1516_v8, %v1511_v6  ;;  %v1347_v40 = vadd.f32 %v2675_v22, %v1265_v10  ;;  %v1665_v10 = vrot.slane %v1357_v4, %v2812_v52 }
 0x2b0   :  { %v2837_v13 = vsel %vm1677_vm3, %v1597_v12, %v1518_v11 }
 0x2b1   :  { %v1615_v24 = vrot.slane %v1347_v40, %v2699_v36 }
 0x2b2   :  { %v1262_v15 = vpop.xlane.xlu0 %1261 }
 0x2b3   :  { %v1346_v33 = vadd.f32 %v2675_v22, %v1262_v15 }
 0x2b5   :  { %v1610_v38 = vrot.slane %v1346_v33, %v2695_v34 }
 0x2b6   :  { %v1271_v21 = vpop.xlane.xlu0 %1270 }
 0x2b7   :  { %v1611_v20 = vsel %vm1426_vm5, %v1610_v38, %v1606_v41  ;;  %v1349_v26 = vadd.f32 %v2675_v22, %v1271_v21 }
 0x2b8   :  { %v1616_v44 = vsel %vm1433_vm6, %v1615_v24, %v1611_v20 }
 0x2b9   :  { %v1625_v25 = vrot.slane %v1349_v26, %v2711_v45 }
 0x2ba   :  { %v1268_v29 = vpop.xlane.xlu0 %1267 }
 0x2bb   :  { %v1348_v39 = vadd.f32 %v2675_v22, %v1268_v29 }
 0x2bd   :  { %v1620_v27 = vrot.slane %v1348_v39, %v2703_v16 }
 0x2be   :  { %v1277_v32 = vpop.xlane.xlu0 %1276 }
 0x2bf   :  { %v1621_v46 = vsel %vm1440_vm7, %v1620_v27, %v1616_v44  ;;  %v1351_v49 = vadd.f32 %v2675_v22, %v1277_v32 }
 0x2c0   :  { %v1626_v16 = vsel %vm1447_vm8, %v1625_v25, %v1621_v46 }
 0x2c1   :  { %v1635_v14 = vrot.slane %v1351_v49, %v2727_v58  ;;  %v1301_v58 = vpop.xlane.xlu1 %1300 }
 0x2c2   :  { %v1274_v3 = vpop.xlane.xlu0 %1273 }
 0x2c3   :  { %v1350_v43 = vadd.f32 %v2675_v22, %v1274_v3 }
 0x2c5   :  { %v1630_v47 = vrot.slane %v1350_v43, %v2717_v50 }
 0x2c6   :  { %v1283_v42 = vpop.xlane.xlu0 %1282 }
 0x2c7   :  { %v1631_v36 = vsel %vm1454_vm9, %v1630_v47, %v1626_v16  ;;  %v1353_v55 = vadd.f32 %v2675_v22, %v1283_v42 }
 0x2c8   :  { %v1636_v50 = vsel %vm1461_vm10, %v1635_v14, %v1631_v36 }
 0x2c9   :  { %v1645_v17 = vrot.slane %v1353_v55, %v2741_v7  ;;  %v1359_v7 = vadd.f32 %v2675_v22, %v1301_v58 }
 0x2ca   :  { %v1280_v34 = vpop.xlane.xlu0 %1279 }
 0x2cb   :  { %v1352_v48 = vadd.f32 %v2675_v22, %v1280_v34  ;;  %v1675_v12 = vrot.slane %v1359_v7, %v2822_v60 }
 0x2cd   :  { %v1640_v53 = vrot.slane %v1352_v48, %v2732_v62 }
 0x2ce   :  { %v1289_v51 = vpop.xlane.xlu0 %1288 }
 0x2cf   :  { %v1641_v59 = vsel %vm1468_vm11, %v1640_v53, %v1636_v50  ;;  %v1355_v61 = vadd.f32 %v2675_v22, %v1289_v51 }
 0x2d0   :  { %v1646_v62 = vsel %vm1475_vm12, %v1645_v17, %v1641_v59 }
 0x2d1   :  { %v1655_v5 = vrot.slane %v1355_v61, %v2790_v18 }
 0x2d2   :  { %v1286_v57 = vpop.xlane.xlu0 %1285 }
 0x2d3   :  { %v1354_v45 = vadd.f32 %v2675_v22, %v1286_v57 }
 0x2d5   :  { %v1650_v63 = vrot.slane %v1354_v45, %v2745_v9 }
 0x2d6   :  { %v1292_v0 = vpop.xlane.xlu0 %1291 }
 0x2d7   :  { %v1651_v1 = vsel %vm1482_vm13, %v1650_v63, %v1646_v62  ;;  %v1356_v2 = vadd.f32 %v2675_v22, %v1292_v0 }
 0x2d8   :  { %v1656_v23 = vsel %vm1489_vm14, %v1655_v5, %v1651_v1 }
 0x2d9   :  { %v1660_v19 = vrot.slane %v1356_v2, %v2794_v28 }
 0x2da   :  { %v1298_v8 = vpop.xlane.xlu0 %1297 }
 0x2db   :  { %v1661_v9 = vsel %vm1496_vm15, %v1660_v19, %v1656_v23  ;;  %v1358_v6 = vadd.f32 %v2675_v22, %v1298_v8 }
 0x2dc   :  { %v1666_v18 = vsel %vm1503_vm0, %v1665_v10, %v1661_v9 }
 0x2dd   :  { %v1670_v11 = vrot.slane %v1358_v6, %v2816_v54 }
 0x2df   :  { %v1671_v28 = vsel %vm1510_vm1, %v1670_v11, %v1666_v18 }
 0x2e0   :  { %v1676_v15 = vsel %vm1517_vm2, %v1675_v12, %v1671_v28 }
 0x2e1   :  { %v1680_v21 = vsel %vm1679_vm4, %v1676_v15, %v2837_v13 }
 0x2e2   :  { %1682 = vst [vmem:[#allocation3] sm:$0x7] %v1680_v21 }
 0x2e3   :  { %2114 = shalt.err (!%p2111_p4)
}
 0x2e4   :  { %s2115_s25 = scalar_lea.hbm %s2906_s7, 64 }
 0x2e5   :  { %p2116_p5 = scmp.ne.s32.totalorder %s2906_s7, %s2115_s25  ;;  %p2119_p6 = scmp.lt.u32.totalorder %s2115_s25, %s2906_s7 }
 0x2e7   :  { %p2121_p7 = pnand %p2119_p6, %p2116_p5 }
 0x2e9   :  { %2124 = shalt.err (!%p2121_p7)
}
 0x2ea   :  { %1692 = dma.vmem_to_hbm [thread:$0]  %s1690_s5, 64, %s2906_s7, [#allocation4]  }
 0x2eb   :  { %2125 = dma.done.wait [#allocation4], 64  }
 0x2ec   :  { %2126 = vsyncadd [#allocation4], 4294967232 }
 0x2ed   :  { %1696 = vsyncpa [#allocation4], 1 }

</bundles_post_ra>
